<compile_context>
chip_gen: v7x
topology: tpu7x:2x2x1
jax: 0.10.0
libtpu: 0.0.40
codegen_flags: <defaults>
</compile_context>

<pallas_src>
import jax
import jax.numpy as jnp
from jax.experimental import pallas as pl
from jax.experimental.pallas import tpu as pltpu


def _make_kernel(T, C):
    def kernel(a_ref, b_ref, x_ref, o_ref):
        # a_ref, b_ref: SMEM (1,) f32 scalars; a_ref already holds a / C.
        # x_ref: VMEM (T*C, TILE) merged (time, channel) rows of one batch slice.
        # o_ref: VMEM (T-1, TILE) attention slice.
        a_eff = a_ref[0]
        b = b_ref[0]

        def channel_sum(t):
            # Unrolled static-slice accumulation in f32 (VPU adds, no XLU reduce,
            # no full-block f32 upcast temp).
            s = x_ref[t * C:t * C + 1, :].astype(jnp.float32)       # (1, TILE)
            for c in range(1, C):
                s = s + x_ref[t * C + c:t * C + c + 1, :].astype(jnp.float32)
            return s

        rows = []
        prev = channel_sum(0)
        for t in range(1, T):
            cur = channel_sum(t)
            rows.append(jax.nn.sigmoid(a_eff * jnp.abs(cur - prev) + b))
            prev = cur

        out = rows[0] if len(rows) == 1 else jnp.concatenate(rows, axis=0)
        o_ref[...] = out.astype(o_ref.dtype)                         # one lane-dense store

    return kernel


def _padded_rows(rows, itemsize):
    # Second-to-last dim pads to the sublane multiple for this dtype width.
    sub = max(8 * 4 // itemsize, 8)
    return -(-rows // sub) * sub


def _vmem_tile_cap(T, C, in_itemsize, out_itemsize, budget_bytes):
    # Bytes per lane-column of one (input block + output block), double buffered.
    in_bpl = _padded_rows(T * C, in_itemsize) * in_itemsize
    out_bpl = _padded_rows(T - 1, out_itemsize) * out_itemsize
    per_lane = 2 * (in_bpl + out_bpl)
    cap = budget_bytes // per_lane
    return max((cap // 128) * 128, 128)


def _pick_tile(HW, tile_cap, want_even_steps):
    """Pick a lane tile: full extent if it fits, else a 128-multiple divisor of HW."""
    if HW <= tile_cap:
        return HW, 1                       # full-extent block is always legal
    tile_cap = max((tile_cap // 128) * 128, 128)
    if HW % 128 == 0:
        units = HW // 128
        cap_units = max(tile_cap // 128, 1)
        candidates = [(u * 128, units // u)
                      for u in range(cap_units, 0, -1) if units % u == 0]
        if candidates:
            tile, steps = candidates[0]    # largest exact-divisor tile
            if want_even_steps and steps % 2 == 1:
                # Prefer an even step count (v7x: 2 TCs) if it costs <= 2x tile size.
                for t, s in candidates:
                    if s % 2 == 0 and t * 2 >= tile:
                        return t, s
            return tile, steps
    # HW not 128-aligned (or no divisor): fixed cap tile, masked trailing block.
    return tile_cap, pl.cdiv(HW, tile_cap)


def motion_prompt(x, a, b, *, tile_lanes=None, vmem_budget_bytes=24 * 1024 * 1024):
    """x: (B, T, C, H, W); a, b: (1,) parameters. Returns (A_expanded, A, None)."""
    B, T, C, H, W = x.shape
    if T < 2:
        raise ValueError("MotionPrompt needs at least 2 frames (T >= 2).")
    # PyTorch's expand(B, 2, 3, H, W) requires T-1 in (1, 2); keep the same contract.
    assert T - 1 in (1, 2), "expand(B, 2, 3, H, W) requires T == 2 or T == 3"

    HW = H * W
    out_dtype = x.dtype
    in_itemsize = jnp.dtype(x.dtype).itemsize
    out_itemsize = jnp.dtype(out_dtype).itemsize

    # Default tile cap: big blocks (1-4 MB real input bytes); clamp by padded VMEM use.
    if tile_lanes is None:
        tile_lanes = 32768 if in_itemsize >= 4 else 65536
    tile_cap = min(tile_lanes,
                   _vmem_tile_cap(T, C, in_itemsize, out_itemsize, vmem_budget_bytes))
    tile, n_spatial = _pick_tile(HW, tile_cap, want_even_steps=(B % 2 == 1))

    # Lane-dense layout with merged (T, C) rows: block (T*C, tile) -> less sublane
    # padding and a pure-VPU channel sum in the kernel.
    xf = x.reshape(B, T * C, HW)

    # Fold the 1/C of the channel mean into 'a' (exactly equivalent math).
    a_eff = (a.astype(jnp.float32) / jnp.float32(C))
    b_f32 = b.astype(jnp.float32)

    A_flat = pl.pallas_call(
        _make_kernel(T, C),
        out_shape=jax.ShapeDtypeStruct((B, T - 1, HW), out_dtype),
        grid=(B, n_spatial),
        in_specs=[
            pl.BlockSpec(memory_space=pltpu.MemorySpace.SMEM),                 # a_eff
            pl.BlockSpec(memory_space=pltpu.MemorySpace.SMEM),                 # b
            pl.BlockSpec((None, T * C, tile), lambda i, j: (i, 0, j)),         # x
        ],
        out_specs=pl.BlockSpec((None, T - 1, tile), lambda i, j: (i, 0, j)),
        compiler_params=pltpu.CompilerParams(
            dimension_semantics=("parallel", "parallel"),
            # 32 MiB is safe on all generations (v7x has only 64 MiB physical);
            # the padded-footprint tile cap above keeps us comfortably inside it.
            vmem_limit_bytes=32 * 1024 * 1024,
        ),
    )(a_eff, b_f32, xf)

    A = A_flat.reshape(B, T - 1, H, W)

    # torch: A.unsqueeze(2).expand(B, 2, 3, H, W). Kept lazy; if this escapes the
    # jit boundary unfused it materializes a 3x H*W write -- prefer consuming A.
    A_exp = jnp.broadcast_to(A[:, :, None, :, :], (B, 2, 3, H, W))
    return A_exp, A, None


if __name__ == "__main__":
    key = jax.random.PRNGKey(0)
    kx, ka, kb = jax.random.split(key, 3)

    # The forward's expand(B, 2, 3, H, W) implies T = 3 (T-1 == 2); C = 3.
    # W = 224 (not a multiple of 128) exercises the lane-dense H*W flatten.
    B, T, C, H, W = 2, 3, 3, 16, 224
    x = jax.random.normal(kx, (B, T, C, H, W), dtype=jnp.float32)
    a = jax.random.normal(ka, (1,), dtype=jnp.float32)
    b = jax.random.normal(kb, (1,), dtype=jnp.float32)

    def ref_fn(x, a, b):
        gray = x.mean(axis=2)
        D = gray[:, 1:] - gray[:, :-1]
        return jax.nn.sigmoid(a[0] * jnp.abs(D) + b[0])

    A_ref = ref_fn(x, a, b)

    # 1) Default path: HW = 3584 fits the tile cap -> single full-extent block.
    fwd = jax.jit(motion_prompt)
    A_exp, A, third = fwd(x, a, b)
    A_exp = jax.block_until_ready(A_exp)
    A = jax.block_until_ready(A)
    assert third is None
    assert A.shape == (B, T - 1, H, W) and A.dtype == x.dtype
    assert A_exp.shape == (B, 2, 3, H, W)
    assert jnp.allclose(A, A_ref, atol=1e-5, rtol=1e-5)
    assert jnp.allclose(
        A_exp, jnp.broadcast_to(A_ref[:, :, None], (B, 2, 3, H, W)),
        atol=1e-5, rtol=1e-5)

    # 2) Forced multi-step tiling (exact-divisor path: HW=3584 -> tile=896, 4 steps).
    fwd_tiled = jax.jit(lambda x, a, b: motion_prompt(x, a, b, tile_lanes=1024))
    _, A2, _ = fwd_tiled(x, a, b)
    A2 = jax.block_until_ready(A2)
    assert jnp.allclose(A2, A_ref, atol=1e-5, rtol=1e-5)

    # 3) HW not a multiple of 128 -> masked trailing-block fallback path.
    H3, W3 = 7, 60  # HW = 420
    x3 = jax.random.normal(kx, (B, T, C, H3, W3), dtype=jnp.float32)
    _, A3, _ = jax.jit(lambda x, a, b: motion_prompt(x, a, b, tile_lanes=256))(x3, a, b)
    A3 = jax.block_until_ready(A3)
    assert jnp.allclose(A3, ref_fn(x3, a, b), atol=1e-5, rtol=1e-5)

    # 4) bf16 input: output dtype follows x (PyTorch-matching); looser tolerance.
    xb = x.astype(jnp.bfloat16)
    _, Ab, _ = jax.jit(motion_prompt)(xb, a, b)
    Ab = jax.block_until_ready(Ab)
    assert Ab.dtype == jnp.bfloat16
    assert jnp.allclose(Ab.astype(jnp.float32), A_ref, atol=2e-2, rtol=2e-2)

    print("KERNEL_OK")
</pallas_src>

<mosaic_0001>
module attributes {stable_mosaic.version = 11 : i64} {
  func.func @kernel(%arg0: i32, %arg1: i32, %arg2: memref<1xf32, #tpu.memory_space<smem>>, %arg3: memref<1xf32, #tpu.memory_space<smem>>, %arg4: memref<1x9x3584xf32, #tpu.memory_space<vmem>>, %arg5: memref<1x2x3584xf32, #tpu.memory_space<vmem>>) attributes {dimension_semantics = [#tpu.dimension_semantics<parallel>, #tpu.dimension_semantics<parallel>], iteration_bounds = array<i64: 2, 1>, scalar_prefetch = 0 : i64, scratch_operands = 0 : i64, tpu.core_type = #tpu.core_type<tc>, window_params = [{transform_indices = @transform_0, window_bounds = array<i64: 1>}, {transform_indices = @transform_1, window_bounds = array<i64: 1>}, {transform_indices = @transform_2, window_bounds = array<i64: 1, 9, 3584>}, {transform_indices = @transform_3, window_bounds = array<i64: 1, 2, 3584>}]} {
    %c0 = arith.constant 0 : index
    %0 = memref.load %arg2[%c0] : memref<1xf32, #tpu.memory_space<smem>>
    %c0_0 = arith.constant 0 : index
    %1 = memref.load %arg3[%c0_0] : memref<1xf32, #tpu.memory_space<smem>>
    %c0_1 = arith.constant 0 : index
    %c0_2 = arith.constant 0 : index
    %c0_3 = arith.constant 0 : index
    %2 = vector.load %arg4[%c0_1, %c0_2, %c0_3] : memref<1x9x3584xf32, #tpu.memory_space<vmem>>, vector<1x1x3584xf32>
    %3 = vector.shape_cast %2 : vector<1x1x3584xf32> to vector<1x3584xf32>
    %c0_4 = arith.constant 0 : index
    %c1 = arith.constant 1 : index
    %c0_5 = arith.constant 0 : index
    %4 = vector.load %arg4[%c0_4, %c1, %c0_5] : memref<1x9x3584xf32, #tpu.memory_space<vmem>>, vector<1x1x3584xf32>
    %5 = vector.shape_cast %4 : vector<1x1x3584xf32> to vector<1x3584xf32>
    %6 = arith.addf %3, %5 : vector<1x3584xf32>
    %c0_6 = arith.constant 0 : index
    %c2 = arith.constant 2 : index
    %c0_7 = arith.constant 0 : index
    %7 = vector.load %arg4[%c0_6, %c2, %c0_7] : memref<1x9x3584xf32, #tpu.memory_space<vmem>>, vector<1x1x3584xf32>
    %8 = vector.shape_cast %7 : vector<1x1x3584xf32> to vector<1x3584xf32>
    %9 = arith.addf %6, %8 : vector<1x3584xf32>
    %c0_8 = arith.constant 0 : index
    %c3 = arith.constant 3 : index
    %c0_9 = arith.constant 0 : index
    %10 = vector.load %arg4[%c0_8, %c3, %c0_9] : memref<1x9x3584xf32, #tpu.memory_space<vmem>>, vector<1x1x3584xf32>
    %11 = vector.shape_cast %10 : vector<1x1x3584xf32> to vector<1x3584xf32>
    %c0_10 = arith.constant 0 : index
    %c4 = arith.constant 4 : index
    %c0_11 = arith.constant 0 : index
    %12 = vector.load %arg4[%c0_10, %c4, %c0_11] : memref<1x9x3584xf32, #tpu.memory_space<vmem>>, vector<1x1x3584xf32>
    %13 = vector.shape_cast %12 : vector<1x1x3584xf32> to vector<1x3584xf32>
    %14 = arith.addf %11, %13 : vector<1x3584xf32>
    %c0_12 = arith.constant 0 : index
    %c5 = arith.constant 5 : index
    %c0_13 = arith.constant 0 : index
    %15 = vector.load %arg4[%c0_12, %c5, %c0_13] : memref<1x9x3584xf32, #tpu.memory_space<vmem>>, vector<1x1x3584xf32>
    %16 = vector.shape_cast %15 : vector<1x1x3584xf32> to vector<1x3584xf32>
    %17 = arith.addf %14, %16 : vector<1x3584xf32>
    %18 = arith.subf %17, %9 : vector<1x3584xf32>
    %19 = math.absf %18 : vector<1x3584xf32>
    %20 = vector.broadcast %0 : f32 to vector<1x3584xf32>
    %21 = arith.mulf %20, %19 : vector<1x3584xf32>
    %22 = vector.broadcast %1 : f32 to vector<1x3584xf32>
    %23 = arith.addf %21, %22 : vector<1x3584xf32>
    %24 = arith.negf %23 : vector<1x3584xf32>
    %25 = math.exp %24 : vector<1x3584xf32>
    %cst = arith.constant 1.000000e+00 : f32
    %26 = vector.broadcast %cst : f32 to vector<1x3584xf32>
    %27 = arith.addf %26, %25 : vector<1x3584xf32>
    %28 = arith.divf %26, %27 : vector<1x3584xf32>
    %c0_14 = arith.constant 0 : index
    %c6 = arith.constant 6 : index
    %c0_15 = arith.constant 0 : index
    %29 = vector.load %arg4[%c0_14, %c6, %c0_15] : memref<1x9x3584xf32, #tpu.memory_space<vmem>>, vector<1x1x3584xf32>
    %30 = vector.shape_cast %29 : vector<1x1x3584xf32> to vector<1x3584xf32>
    %c0_16 = arith.constant 0 : index
    %c7 = arith.constant 7 : index
    %c0_17 = arith.constant 0 : index
    %31 = vector.load %arg4[%c0_16, %c7, %c0_17] : memref<1x9x3584xf32, #tpu.memory_space<vmem>>, vector<1x1x3584xf32>
    %32 = vector.shape_cast %31 : vector<1x1x3584xf32> to vector<1x3584xf32>
    %33 = arith.addf %30, %32 : vector<1x3584xf32>
    %c0_18 = arith.constant 0 : index
    %c8 = arith.constant 8 : index
    %c0_19 = arith.constant 0 : index
    %34 = vector.load %arg4[%c0_18, %c8, %c0_19] : memref<1x9x3584xf32, #tpu.memory_space<vmem>>, vector<1x1x3584xf32>
    %35 = vector.shape_cast %34 : vector<1x1x3584xf32> to vector<1x3584xf32>
    %36 = arith.addf %33, %35 : vector<1x3584xf32>
    %37 = arith.subf %36, %17 : vector<1x3584xf32>
    %38 = math.absf %37 : vector<1x3584xf32>
    %39 = vector.broadcast %0 : f32 to vector<1x3584xf32>
    %40 = arith.mulf %39, %38 : vector<1x3584xf32>
    %41 = vector.broadcast %1 : f32 to vector<1x3584xf32>
    %42 = arith.addf %40, %41 : vector<1x3584xf32>
    %43 = arith.negf %42 : vector<1x3584xf32>
    %44 = math.exp %43 : vector<1x3584xf32>
    %cst_20 = arith.constant 1.000000e+00 : f32
    %45 = vector.broadcast %cst_20 : f32 to vector<1x3584xf32>
    %46 = arith.addf %45, %44 : vector<1x3584xf32>
    %47 = arith.divf %45, %46 : vector<1x3584xf32>
    %48 = tpu.concatenate %28, %47 in 0 : vector<1x3584xf32>, vector<1x3584xf32> -> vector<2x3584xf32>
    %c0_21 = arith.constant 0 : index
    %c0_22 = arith.constant 0 : index
    %c0_23 = arith.constant 0 : index
    %49 = vector.load %arg5[%c0_21, %c0_22, %c0_23] : memref<1x2x3584xf32, #tpu.memory_space<vmem>>, vector<1x2x3584xf32>
    %50 = vector.shape_cast %49 : vector<1x2x3584xf32> to vector<2x3584xf32>
    %51 = vector.shape_cast %48 : vector<2x3584xf32> to vector<1x2x3584xf32>
    tpu.vector_store %arg5[%c0_21, %c0_22, %c0_23], %51 {strides = array<i32>} : memref<1x2x3584xf32, #tpu.memory_space<vmem>>, vector<1x2x3584xf32>,
    return
  }
  func.func @transform_0(%arg0: i32, %arg1: i32) -> i32 {
    %c0_i32 = arith.constant 0 : i32
    %c0_i32_0 = arith.constant 0 : i32
    return %c0_i32 : i32
  }
  func.func @transform_1(%arg0: i32, %arg1: i32) -> i32 {
    %c0_i32 = arith.constant 0 : i32
    %c0_i32_0 = arith.constant 0 : i32
    return %c0_i32 : i32
  }
  func.func @transform_2(%arg0: i32, %arg1: i32) -> (i32, i32, i32) {
    %c0_i32 = arith.constant 0 : i32
    %c0_i32_0 = arith.constant 0 : i32
    return %arg0, %c0_i32, %arg1 : i32, i32, i32
  }
  func.func @transform_3(%arg0: i32, %arg1: i32) -> (i32, i32, i32) {
    %c0_i32 = arith.constant 0 : i32
    %c0_i32_0 = arith.constant 0 : i32
    return %arg0, %c0_i32, %arg1 : i32, i32, i32
  }
}

</mosaic_0001>

<bundles_post_ra>
// kernel: motion_prompt.1
= control target key start
LH: loop header
LB: loop body
LE: loop exit
PB: predicated region body
PF: predicated region fallthrough
CT: control target
= control target key end

     0   :  { %s1198_s16 = smov 0   ;;  %s1200_s17 = smov 0   ;;  %s1451_s0 = inlined_call_operand.<no memory space> [shape: f32[1], index: 0, kind: input, shape index: {}]   ;;  %s1452_s1 = inlined_call_operand.<no memory space> [shape: f32[1], index: 1, kind: input, shape index: {}]   ;;  %s1453_s2 = inlined_call_operand.vmem [shape: f32[2,9,3584], index: 2, kind: input, shape index: {}]   ;;  %s1454_s3 = inlined_call_operand.vmem [shape: f32[2,2,3584], index: 3, kind: output, shape index: {}]  }
   0x1   :  { %8 = sst [smem:[#allocation2]] %s1451_s0  ;;  %s1202_s18 = smov 0  }
   0x2   :  { %9 = sst [smem:[#allocation3]] %s1452_s1 }
   0x3 LB: > { %s27_s0 = sadd.s32 1, %s1165_s17  ;;  %p1014_p0 = scmp.ge.s32.totalorder %s1169_s18, 1  ;;  %s1169_s18 = sphi %s1202_s18, %s15_s18   ;;  %s1165_s17 = sphi %s1200_s17, %s1456_s17   ;;  %s1161_s16 = sphi %s1198_s16, %s1455_s16  }
   0x4   : > { %p29_p1 = scmp.ge.s32.totalorder %s27_s0, 2  ;;  %p160_p2 = scmp.lt.s32.totalorder %s1169_s18, 3 }
   0x6   : > { %s1458_s0 = smov (%p29_p1, %s27_s0), 0  ;;  %p161_p3 = pnand %p1014_p0, %p160_p2 }
   0x7   : > { %p193_p4 = scmp.lt.s32.totalorder (!%p161_p3), %s1161_s16, 1  ;;  %s1219_s19 = sld [smem:[#allocation2]] (!%p161_p3)  ;;  %vm733_vm0 = vcmask (!%p161_p3), 1040384  }
   0x8   : > { %164 = sbr.rel (%p161_p3) target bundleno = 118 (0x76), region = 32  ;;  %s1226_s23 = sld [smem:[#allocation3]] (!%p161_p3) }
   0xd   : > { %v1253_v41 = vstv (!%p161_p3), %s1219_s19 }
   0xe   : > { %v1259_v50 = vstv (!%p161_p3), %s1226_s23 }
   0xf   : > { %s1460_s16 = smov (!%p193_p4, %s1161_s16), 1 }
  0x10   : > { %s1088_s1 = smul.u32 448, %s1460_s16 }
  0x11   : > { %s1089_s24 = smul.u32 56, %s1460_s16 }
  0x12   : > { %s1224_s22 = scalar_lea.vmem %s1453_s2, %s1088_s1 }
  0x13   : > { %v214_v0 = vld [vmem:[%s1224_s22] ss:$8 sm:$0xf]  ;;  %v1022_v3 = vld [vmem:[%s1224_s22 + $0x1] ss:$8 sm:$0xf]  ;;  %s1360_s27 = scalar_lea.vmem %s1454_s3, %s1089_s24 }
  0x14   : > { %v215_v1 = vld [vmem:[%s1224_s22] ss:$8 sm:$0xf0]  ;;  %v1023_v4 = vld [vmem:[%s1224_s22 + $0x1] ss:$8 sm:$0xf0] }
  0x15   : > { %v216_v2 = vor.u32 %v215_v1, %v214_v0  ;;  %v230_v5 = vor.u32 %v1023_v4, %v1022_v3  ;;  %v1029_v6 = vld [vmem:[%s1224_s22 + $0x2] ss:$8 sm:$0xf]  ;;  %v1036_v9 = vld [vmem:[%s1224_s22 + $0x3] ss:$8 sm:$0xf] }
  0x16   : > { %v1030_v7 = vld [vmem:[%s1224_s22 + $0x2] ss:$8 sm:$0xf0]  ;;  %v1037_v10 = vld [vmem:[%s1224_s22 + $0x3] ss:$8 sm:$0xf0] }
  0x17   : > { %v248_v8 = vor.u32 %v1030_v7, %v1029_v6  ;;  %v241_v11 = vadd.f32 %v230_v5, %v216_v2  ;;  %v266_v12 = vor.u32 %v1037_v10, %v1036_v9  ;;  %v1043_v13 = vld [vmem:[%s1224_s22 + $0x4] ss:$8 sm:$0xf]  ;;  %v1050_v16 = vld [vmem:[%s1224_s22 + $0x5] ss:$8 sm:$0xf] }
  0x18   : > { %v1044_v14 = vld [vmem:[%s1224_s22 + $0x4] ss:$8 sm:$0xf0]  ;;  %v1051_v17 = vld [vmem:[%s1224_s22 + $0x5] ss:$8 sm:$0xf0] }
  0x19   : > { %v280_v15 = vor.u32 %v1044_v14, %v1043_v13  ;;  %v298_v18 = vor.u32 %v1051_v17, %v1050_v16  ;;  %v1061_v19 = vld [vmem:[%s1224_s22 + $0x6] ss:$8 sm:$0xf]  ;;  %v259_v21 = vadd.f32 %v248_v8, %v241_v11  ;;  %v1068_v24 = vld [vmem:[%s1224_s22 + $0x7] ss:$8 sm:$0xf] }
  0x1a   : > { %v1062_v20 = vld [vmem:[%s1224_s22 + $0x6] ss:$8 sm:$0xf0]  ;;  %v1069_v25 = vld [vmem:[%s1224_s22 + $0x7] ss:$8 sm:$0xf0] }
  0x1b   : > { %v291_v22 = vadd.f32 %v280_v15, %v266_v12  ;;  %v358_v23 = vor.u32 %v1062_v20, %v1061_v19  ;;  %v372_v26 = vor.u32 %v1069_v25, %v1068_v24  ;;  %v1075_v27 = vld [vmem:[%s1224_s22 + $0xe0] ss:$8 sm:$0xf]  ;;  %v1024_v35 = vld [vmem:[%s1224_s22 + $0x41] ss:$8 sm:$0xf] }
  0x1c   : > { %v1076_v28 = vld [vmem:[%s1224_s22 + $0xe0] ss:$8 sm:$0xf0]  ;;  %v1025_v36 = vld [vmem:[%s1224_s22 + $0x41] ss:$8 sm:$0xf0] }
  0x1d   : > { %v309_v29 = vadd.f32 %v298_v18, %v291_v22  ;;  %v390_v30 = vor.u32 %v1076_v28, %v1075_v27  ;;  %v1017_v31 = vld [vmem:[%s1224_s22 + $0x40] ss:$8 sm:$0xf]  ;;  %v383_v33 = vadd.f32 %v372_v26, %v358_v23  ;;  %v234_v38 = vor.u32 %v1025_v36, %v1024_v35  ;;  %v1031_v39 = vld [vmem:[%s1224_s22 + $0x42] ss:$8 sm:$0xf] }
  0x1e   : > { %v1018_v32 = vld [vmem:[%s1224_s22 + $0x40] ss:$8 sm:$0xf0]  ;;  %v1032_v40 = vld [vmem:[%s1224_s22 + $0x42] ss:$8 sm:$0xf0] }
  0x1f   : > { %v220_v34 = vor.u32 %v1018_v32, %v1017_v31  ;;  %v313_v37 = vsub.f32 %v309_v29, %v259_v21  ;;  %v401_v42 = vadd.f32 %v390_v30, %v383_v33  ;;  %v1038_v43 = vld [vmem:[%s1224_s22 + $0x43] ss:$8 sm:$0xf]  ;;  %v252_v47 = vor.u32 %v1032_v40, %v1031_v39  ;;  %v1045_v49 = vld [vmem:[%s1224_s22 + $0x44] ss:$8 sm:$0xf] }
  0x20   : > { %v1039_v44 = vld [vmem:[%s1224_s22 + $0x43] ss:$8 sm:$0xf0]  ;;  %v1046_v52 = vld [vmem:[%s1224_s22 + $0x44] ss:$8 sm:$0xf0] }
  0x21   : > { %v317_v45 = vand.u32 2147483647, %v313_v37  ;;  %v242_v46 = vadd.f32 %v234_v38, %v220_v34  ;;  %v270_v48 = vor.u32 %v1039_v44, %v1038_v43  ;;  %v405_v51 = vsub.f32 %v401_v42, %v309_v29  ;;  %v1052_v53 = vld [vmem:[%s1224_s22 + $0x45] ss:$8 sm:$0xf] }
  0x22   : > { %v284_v55 = vor.u32 %v1046_v52, %v1045_v49  ;;  %v1053_v56 = vld [vmem:[%s1224_s22 + $0x45] ss:$8 sm:$0xf0]  ;;  %v1063_v57 = vld [vmem:[%s1224_s22 + $0x46] ss:$8 sm:$0xf] }
  0x23   : > { %v322_v54 = vmul.f32 %v1253_v41, %v317_v45  ;;  %v409_v58 = vand.u32 2147483647, %v405_v51  ;;  %v302_v59 = vor.u32 %v1053_v56, %v1052_v53  ;;  %v1064_v60 = vld [vmem:[%s1224_s22 + $0x46] ss:$8 sm:$0xf0]  ;;  %v260_v62 = vadd.f32 %v252_v47, %v242_v46 }
  0x24   : > { %v292_v63 = vadd.f32 %v284_v55, %v270_v48  ;;  %v362_v0 = vor.u32 %v1064_v60, %v1063_v57  ;;  %v1070_v1 = vld [vmem:[%s1224_s22 + $0x47] ss:$8 sm:$0xf]  ;;  %v1077_v5 = vld [vmem:[%s1224_s22 + $0x120] ss:$8 sm:$0xf]  ;;  %v449_v57 = vlaneseq }
  0x25   : > { %v327_v61 = vadd.f32 %v1259_v50, %v322_v54  ;;  %v1071_v2 = vld [vmem:[%s1224_s22 + $0x47] ss:$8 sm:$0xf0]  ;;  %v413_v3 = vmul.f32 %v409_v58, %v1253_v41  ;;  %v1078_v6 = vld [vmem:[%s1224_s22 + $0x120] ss:$8 sm:$0xf0] }
  0x26   : > { %v376_v4 = vor.u32 %v1071_v2, %v1070_v1  ;;  %v310_v8 = vadd.f32 %v302_v59, %v292_v63  ;;  %v394_v9 = vor.u32 %v1078_v6, %v1077_v5  ;;  %v1019_v10 = vld [vmem:[%s1224_s22 + $0x80] ss:$8 sm:$0xf]  ;;  %v1026_v14 = vld [vmem:[%s1224_s22 + $0x81] ss:$8 sm:$0xf] }
  0x27   : > { %v1057_v7 = vmul.f32 -1.442695, %v327_v61  ;;  %v417_v11 = vadd.f32 %v413_v3, %v1259_v50  ;;  %v1020_v13 = vld [vmem:[%s1224_s22 + $0x80] ss:$8 sm:$0xf0] }
  0x28   : > { %v384_v12 = vadd.f32 %v376_v4, %v362_v0  ;;  %v314_v15 = vsub.f32 %v310_v8, %v260_v62  ;;  %v224_v16 = vor.u32 %v1020_v13, %v1019_v10  ;;  %v1027_v17 = vld [vmem:[%s1224_s22 + $0x81] ss:$8 sm:$0xf0]  ;;  %v1033_v18 = vld [vmem:[%s1224_s22 + $0x82] ss:$8 sm:$0xf] }
  0x29   : > { %1115 = vpow2.f32 %v1057_v7  ;;  %v1082_v19 = vmul.f32 -1.442695, %v417_v11  ;;  %v238_v21 = vor.u32 %v1027_v17, %v1026_v14  ;;  %v1034_v22 = vld [vmem:[%s1224_s22 + $0x82] ss:$8 sm:$0xf0]  ;;  %v450_v14 = vshrl.u32 %v449_v57, 7 }
  0x2a   : > { %v402_v20 = vadd.f32 %v394_v9, %v384_v12  ;;  %v318_v23 = vand.u32 2147483647, %v314_v15  ;;  %v1040_v24 = vld [vmem:[%s1224_s22 + $0x83] ss:$8 sm:$0xf]  ;;  %v256_v27 = vor.u32 %v1034_v22, %v1033_v18 }
  0x2b   : > { %1117 = vpow2.f32 %v1082_v19  ;;  %v243_v26 = vadd.f32 %v238_v21, %v224_v16  ;;  %v1041_v28 = vld [vmem:[%s1224_s22 + $0x83] ss:$8 sm:$0xf0]  ;;  %v1047_v29 = vld [vmem:[%s1224_s22 + $0x84] ss:$8 sm:$0xf] }
  0x2c   : > { %v406_v25 = vsub.f32 %v402_v20, %v310_v8  ;;  %v323_v30 = vmul.f32 %v1253_v41, %v318_v23  ;;  %v274_v31 = vor.u32 %v1041_v28, %v1040_v24  ;;  %v1048_v32 = vld [vmem:[%s1224_s22 + $0x84] ss:$8 sm:$0xf0]  ;;  %v1054_v33 = vld [vmem:[%s1224_s22 + $0x85] ss:$8 sm:$0xf] }
  0x2d   : > { %v288_v35 = vor.u32 %v1048_v32, %v1047_v29  ;;  %v1055_v36 = vld [vmem:[%s1224_s22 + $0x85] ss:$8 sm:$0xf0]  ;;  %v1065_v39 = vld [vmem:[%s1224_s22 + $0x86] ss:$8 sm:$0xf]  ;;  %v261_v43 = vadd.f32 %v256_v27, %v243_v26 }
  0x2e   : > { %v410_v34 = vand.u32 2147483647, %v406_v25  ;;  %v328_v37 = vadd.f32 %v1259_v50, %v323_v30  ;;  %v306_v38 = vor.u32 %v1055_v36, %v1054_v33  ;;  %v1066_v40 = vld [vmem:[%s1224_s22 + $0x86] ss:$8 sm:$0xf0]  ;;  %v1307_v26 = vsub.s32 0, %v450_v14 }
  0x2f   : > { %v293_v44 = vadd.f32 %v288_v35, %v274_v31  ;;  %v366_v45 = vor.u32 %v1066_v40, %v1065_v39  ;;  %v1072_v46 = vld [vmem:[%s1224_s22 + $0x87] ss:$8 sm:$0xf]  ;;  %v1079_v51 = vld [vmem:[%s1224_s22 + $0x160] ss:$8 sm:$0xf] }
  0x30   : > { %v414_v42 = vmul.f32 %v410_v34, %v1253_v41  ;;  %v1073_v47 = vld [vmem:[%s1224_s22 + $0x87] ss:$8 sm:$0xf0]  ;;  %v1058_v48 = vmul.f32 -1.442695, %v328_v37  ;;  %v1309_v27 = vsub.s32 1, %v450_v14 }
  0x31   : > { %v380_v49 = vor.u32 %v1073_v47, %v1072_v46  ;;  %v311_v53 = vadd.f32 %v306_v38, %v293_v44  ;;  %v1080_v54 = vld [vmem:[%s1224_s22 + $0x160] ss:$8 sm:$0xf0]  ;;  %v1028_v60 = vld [vmem:[%s1224_s22 + $0xc1] ss:$8 sm:$0xf] }
  0x32   : > { %v418_v52 = vadd.f32 %v414_v42, %v1259_v50  ;;  %v1021_v55 = vld [vmem:[%s1224_s22 + $0xc0] ss:$8 sm:$0xf]  ;;  %1119 = vpow2.f32 %v1058_v48  ;;  %v398_v59 = vor.u32 %v1080_v54, %v1079_v51  ;;  %v1035_v61 = vld [vmem:[%s1224_s22 + $0xc2] ss:$8 sm:$0xf] }
  0x33   : > { %v1116_v56 = vpop.eup %1115  ;;  %v385_v58 = vadd.f32 %v380_v49, %v366_v45  ;;  %v315_v0 = vsub.f32 %v311_v53, %v261_v43  ;;  %v244_v1 = vadd.f32 %v1028_v60, %v1021_v55  ;;  %v1042_v2 = vld [vmem:[%s1224_s22 + $0xc3] ss:$8 sm:$0xf]  ;;  %v1171_v3 = vmov 1983009808  }
  0x34   : > { %v343_v62 = vadd.f32 1.0, %v1116_v56  ;;  %v1083_v63 = vmul.f32 -1.442695, %v418_v52  ;;  %v793_v4 = vunpack.c.l.s4 %v1171_v3  ;;  %v1049_v6 = vld [vmem:[%s1224_s22 + $0xc4] ss:$8 sm:$0xf] }
  0x35   : > { %v403_v5 = vadd.f32 %v398_v59, %v385_v58  ;;  %v1056_v7 = vld [vmem:[%s1224_s22 + $0xc5] ss:$8 sm:$0xf]  ;;  %v1118_v8 = vpop.eup %1117  ;;  %v319_v9 = vand.u32 2147483647, %v315_v0  ;;  %v262_v10 = vadd.f32 %v1035_v61, %v244_v1  ;;  %v294_v11 = vadd.f32 %v1049_v6, %v1042_v2 }
  0x36   : > { %1121 = vrcp.f32 %v343_v62  ;;  %v1067_v12 = vld [vmem:[%s1224_s22 + $0xc6] ss:$8 sm:$0xf]  ;;  %v433_v13 = vadd.f32 1.0, %v1118_v8  ;;  %v794_v22 = vunpack.c.0.s8 %v793_v4  ;;  %v1311_v28 = vsub.s32 2, %v450_v14 }
  0x37   : > { %1123 = vpow2.f32 %v1083_v63  ;;  %v407_v15 = vsub.f32 %v403_v5, %v311_v53  ;;  %v1074_v16 = vld [vmem:[%s1224_s22 + $0xc7] ss:$8 sm:$0xf]  ;;  %v324_v17 = vmul.f32 %v1253_v41, %v319_v9  ;;  %v312_v18 = vadd.f32 %v1056_v7, %v294_v11  ;;  %v1081_v20 = vld [vmem:[%s1224_s22 + $0x1a0] ss:$8 sm:$0xf] }
  0x38   : > { %v386_v19 = vadd.f32 %v1074_v16, %v1067_v12  ;;  %1125 = vrcp.f32 %v433_v13  ;;  %v1314_v30 = vsub.s32 3, %v450_v14  ;;  %v1316_v35 = vsub.s32 4, %v450_v14 }
  0x39   : > { %v411_v21 = vand.u32 2147483647, %v407_v15  ;;  %v329_v23 = vadd.f32 %v1259_v50, %v324_v17  ;;  %v316_v24 = vsub.f32 %v312_v18, %v262_v10  ;;  %v1318_v36 = vsub.s32 5, %v450_v14 }
  0x3a   : > { %v404_v25 = vadd.f32 %v1081_v20, %v386_v19  ;;  %v1320_v37 = vsub.s32 6, %v450_v14  ;;  %v1324_v43 = vsub.s32 7, %v450_v14  ;;  %v1326_v46 = vsub.s32 %v794_v22, %v450_v14 }
  0x3b   : > { %v415_v29 = vmul.f32 %v411_v21, %v1253_v41  ;;  %v1059_v31 = vmul.f32 -1.442695, %v329_v23  ;;  %v320_v32 = vand.u32 2147483647, %v316_v24 }
  0x3c   : > { %v408_v33 = vsub.f32 %v404_v25, %v312_v18  ;;  %v1120_v34 = vpop.eup %1119 }
  0x3d   : > { %v419_v38 = vadd.f32 %v415_v29, %v1259_v50  ;;  %v344_v39 = vadd.f32 1.0, %v1120_v34  ;;  %1127 = vpow2.f32 %v1059_v31  ;;  %v325_v40 = vmul.f32 %v1253_v41, %v320_v32 }
  0x3e   : > { %v412_v42 = vand.u32 2147483647, %v408_v33 }
  0x3f   : > { %v1084_v44 = vmul.f32 -1.442695, %v419_v38  ;;  %1129 = vrcp.f32 %v344_v39  ;;  %v330_v47 = vadd.f32 %v1259_v50, %v325_v40 }
  0x40   : > { %v1122_v45 = vpop.eup %1121  ;;  %v416_v53 = vmul.f32 %v412_v42, %v1253_v41 }
  0x41   : > { %v1124_v48 = vpop.eup %1123  ;;  %v452_v49 = vrot.slane %v1122_v45, %v1307_v26  ;;  %v456_v51 = vrot.slane %v1122_v45, %v1309_v27  ;;  %v460_v52 = vrot.slane %v1122_v45, %v1311_v28  ;;  %v464_v54 = vrot.slane %v1122_v45, %v1314_v30 }
  0x42   : > { %v468_v55 = vrot.slane %v1122_v45, %v1316_v35  ;;  %v472_v56 = vrot.slane %v1122_v45, %v1318_v36  ;;  %v476_v57 = vrot.slane %v1122_v45, %v1320_v37  ;;  %v1126_v58 = vpop.eup %1125  ;;  %v480_v59 = vrot.slane %v1122_v45, %v1324_v43 }
  0x43   : > { %v434_v60 = vadd.f32 1.0, %v1124_v48  ;;  %1131 = vpow2.f32 %v1084_v44  ;;  %v1060_v61 = vmul.f32 -1.442695, %v330_v47  ;;  %v596_v62 = vrot.slane %v1126_v58, %v1307_v26 }
  0x44   : > { %v600_v63 = vrot.slane %v1126_v58, %v1309_v27  ;;  %v604_v41 = vrot.slane %v1126_v58, %v1311_v28  ;;  %v608_v0 = vrot.slane %v1126_v58, %v1314_v30  ;;  %v612_v1 = vrot.slane %v1126_v58, %v1316_v35 }
  0x45   : > { %v616_v2 = vrot.slane %v1126_v58, %v1318_v36  ;;  %v620_v3 = vrot.slane %v1126_v58, %v1320_v37  ;;  %v624_v4 = vrot.slane %v1126_v58, %v1324_v43  ;;  %v734_v5 = vsel %vm733_vm0, %v452_v49, %v596_v62 }
  0x46   : > { %v735_v6 = vsel %vm733_vm0, %v456_v51, %v600_v63  ;;  %v736_v7 = vsel %vm733_vm0, %v460_v52, %v604_v41  ;;  %v737_v8 = vsel %vm733_vm0, %v464_v54, %v608_v0  ;;  %v738_v11 = vsel %vm733_vm0, %v468_v55, %v612_v1 }
  0x47   : > { %v790_v9 = vcombine.low %v734_v5, %v735_v6  ;;  %v791_v10 = vcombine.low %v736_v7, %v737_v8  ;;  %v739_v12 = vsel %vm733_vm0, %v472_v56, %v616_v2  ;;  %v1128_v13 = vpop.eup %1127  ;;  %v740_v14 = vsel %vm733_vm0, %v476_v57, %v620_v3 }
  0x48   : > { %v741_v15 = vsel %vm733_vm0, %v480_v59, %v624_v4  ;;  %v807_v16 = vcombine.low %v738_v11, %v739_v12  ;;  %1133 = vrcp.f32 %v434_v60  ;;  %v345_v20 = vadd.f32 1.0, %v1128_v13 }
  0x49   : > { %v798_v17 = vrot.slane %v790_v9, %v1326_v46  ;;  %v805_v18 = vrot.slane %v791_v10, %v1326_v46  ;;  %v808_v19 = vcombine.low %v740_v14, %v741_v15  ;;  %v1130_v21 = vpop.eup %1129  ;;  %1135 = vpow2.f32 %v1060_v61 }
  0x4a   : > { %v815_v22 = vrot.slane %v807_v16, %v1326_v46  ;;  %v420_v23 = vadd.f32 %v416_v53, %v1259_v50  ;;  %1137 = vrcp.f32 %v345_v20  ;;  %v484_v34 = vrot.slane %v1130_v21, %v1307_v26 }
  0x4b   : > { %v806_v24 = vcombine.low %v798_v17, %v805_v18  ;;  %v822_v25 = vrot.slane %v808_v19, %v1326_v46  ;;  %v488_v38 = vrot.slane %v1130_v21, %v1309_v27  ;;  %v492_v39 = vrot.slane %v1130_v21, %v1311_v28 }
  0x4c   : > { %v1085_v33 = vmul.f32 -1.442695, %v420_v23  ;;  %v496_v40 = vrot.slane %v1130_v21, %v1314_v30  ;;  %v500_v50 = vrot.slane %v1130_v21, %v1316_v35  ;;  %v504_v44 = vrot.slane %v1130_v21, %v1318_v36 }
  0x4d   : > { %v1132_v29 = vpop.eup %1131  ;;  %916 = vst [vmem:[%s1360_s27] sm:$0xff] %v806_v24  ;;  %v823_v31 = vcombine.low %v815_v22, %v822_v25  ;;  %v508_v45 = vrot.slane %v1130_v21, %v1320_v37  ;;  %v512_v47 = vrot.slane %v1130_v21, %v1324_v43 }
  0x4e   : > { %v435_v32 = vadd.f32 1.0, %v1132_v29 }
  0x4f   : > { %917 = vst [vmem:[%s1360_s27 + $0x8] sm:$0xff] %v823_v31 }
  0x50   : > { %1139 = vrcp.f32 %v435_v32 }
  0x51   : > { %1141 = vpow2.f32 %v1085_v33 }
  0x52   : > { %v1134_v42 = vpop.eup %1133 }
  0x53   : > { %v628_v48 = vrot.slane %v1134_v42, %v1307_v26  ;;  %v632_v49 = vrot.slane %v1134_v42, %v1309_v27  ;;  %v636_v51 = vrot.slane %v1134_v42, %v1311_v28  ;;  %v640_v52 = vrot.slane %v1134_v42, %v1314_v30  ;;  %v1136_v53 = vpop.eup %1135 }
  0x54   : > { %v644_v54 = vrot.slane %v1134_v42, %v1316_v35  ;;  %v648_v55 = vrot.slane %v1134_v42, %v1318_v36  ;;  %v652_v56 = vrot.slane %v1134_v42, %v1320_v37  ;;  %v656_v57 = vrot.slane %v1134_v42, %v1324_v43  ;;  %v1138_v1 = vpop.eup %1137 }
  0x55   : > { %v742_v58 = vsel %vm733_vm0, %v484_v34, %v628_v48  ;;  %v743_v59 = vsel %vm733_vm0, %v488_v38, %v632_v49  ;;  %v744_v60 = vsel %vm733_vm0, %v492_v39, %v636_v51  ;;  %v745_v61 = vsel %vm733_vm0, %v496_v40, %v640_v52 }
  0x56   : > { %v824_v62 = vcombine.low %v742_v58, %v743_v59  ;;  %v825_v63 = vcombine.low %v744_v60, %v745_v61  ;;  %v746_v41 = vsel %vm733_vm0, %v500_v50, %v644_v54  ;;  %v747_v0 = vsel %vm733_vm0, %v504_v44, %v648_v55 }
  0x57   : > { %v748_v2 = vsel %vm733_vm0, %v508_v45, %v652_v56  ;;  %v749_v3 = vsel %vm733_vm0, %v512_v47, %v656_v57  ;;  %v841_v4 = vcombine.low %v746_v41, %v747_v0  ;;  %v346_v5 = vadd.f32 1.0, %v1136_v53 }
  0x58   : > { %v832_v6 = vrot.slane %v824_v62, %v1326_v46  ;;  %v839_v7 = vrot.slane %v825_v63, %v1326_v46  ;;  %v842_v8 = vcombine.low %v748_v2, %v749_v3  ;;  %v516_v9 = vrot.slane %v1138_v1, %v1307_v26 }
  0x59   : > { %v849_v10 = vrot.slane %v841_v4, %v1326_v46  ;;  %v520_v11 = vrot.slane %v1138_v1, %v1309_v27  ;;  %v524_v12 = vrot.slane %v1138_v1, %v1311_v28  ;;  %v528_v13 = vrot.slane %v1138_v1, %v1314_v30 }
  0x5a   : > { %v1140_v14 = vpop.eup %1139  ;;  %v840_v15 = vcombine.low %v832_v6, %v839_v7  ;;  %v856_v16 = vrot.slane %v842_v8, %v1326_v46  ;;  %v532_v17 = vrot.slane %v1138_v1, %v1316_v35  ;;  %v536_v18 = vrot.slane %v1138_v1, %v1318_v36 }
  0x5b   : > { %v660_v19 = vrot.slane %v1140_v14, %v1307_v26  ;;  %v664_v20 = vrot.slane %v1140_v14, %v1309_v27  ;;  %v668_v21 = vrot.slane %v1140_v14, %v1311_v28  ;;  %v672_v22 = vrot.slane %v1140_v14, %v1314_v30  ;;  %v1142_v23 = vpop.eup %1141 }
  0x5c   : > { %918 = vst [vmem:[%s1360_s27 + $0x10] sm:$0xff] %v840_v15  ;;  %v857_v24 = vcombine.low %v849_v10, %v856_v16  ;;  %v540_v25 = vrot.slane %v1138_v1, %v1320_v37  ;;  %v544_v29 = vrot.slane %v1138_v1, %v1324_v43  ;;  %v676_v31 = vrot.slane %v1140_v14, %v1316_v35 }
  0x5d   : > { %v750_v32 = vsel %vm733_vm0, %v516_v9, %v660_v19  ;;  %v751_v33 = vsel %vm733_vm0, %v520_v11, %v664_v20  ;;  %v752_v34 = vsel %vm733_vm0, %v524_v12, %v668_v21  ;;  %v753_v38 = vsel %vm733_vm0, %v528_v13, %v672_v22 }
  0x5e   : > { %919 = vst [vmem:[%s1360_s27 + $0x18] sm:$0xff] %v857_v24  ;;  %v858_v39 = vcombine.low %v750_v32, %v751_v33  ;;  %v859_v40 = vcombine.low %v752_v34, %v753_v38  ;;  %v680_v50 = vrot.slane %v1140_v14, %v1318_v36  ;;  %v684_v42 = vrot.slane %v1140_v14, %v1320_v37 }
  0x5f   : > { %v688_v44 = vrot.slane %v1140_v14, %v1324_v43  ;;  %v754_v35 = vsel %vm733_vm0, %v532_v17, %v676_v31  ;;  %1143 = vrcp.f32 %v346_v5  ;;  %v436_v45 = vadd.f32 1.0, %v1142_v23 }
  0x60   : > { %v866_v47 = vrot.slane %v858_v39, %v1326_v46  ;;  %v873_v48 = vrot.slane %v859_v40, %v1326_v46  ;;  %v755_v49 = vsel %vm733_vm0, %v536_v18, %v680_v50  ;;  %v756_v51 = vsel %vm733_vm0, %v540_v25, %v684_v42 }
  0x61   : > { %v757_v36 = vsel %vm733_vm0, %v544_v29, %v688_v44  ;;  %v875_v52 = vcombine.low %v754_v35, %v755_v49  ;;  %1145 = vrcp.f32 %v436_v45 }
  0x62   : > { %v874_v37 = vcombine.low %v866_v47, %v873_v48  ;;  %v876_v53 = vcombine.low %v756_v51, %v757_v36 }
  0x63   : > { %v883_v43 = vrot.slane %v875_v52, %v1326_v46 }
  0x64   : > { %920 = vst [vmem:[%s1360_s27 + $0x20] sm:$0xff] %v874_v37  ;;  %v890_v54 = vrot.slane %v876_v53, %v1326_v46 }
  0x66   : > { %v891_v55 = vcombine.low %v883_v43, %v890_v54 }
  0x68   : > { %921 = vst [vmem:[%s1360_s27 + $0x28] sm:$0xff] %v891_v55 }
  0x69   : > { %v1144_v56 = vpop.eup %1143 }
  0x6a   : > { %v548_v57 = vrot.slane %v1144_v56, %v1307_v26  ;;  %v552_v58 = vrot.slane %v1144_v56, %v1309_v27  ;;  %v556_v59 = vrot.slane %v1144_v56, %v1311_v28  ;;  %v560_v60 = vrot.slane %v1144_v56, %v1314_v30 }
  0x6b   : > { %v1146_v61 = vpop.eup %1145 }
  0x6c   : > { %v692_v62 = vrot.slane %v1146_v61, %v1307_v26  ;;  %v696_v63 = vrot.slane %v1146_v61, %v1309_v27  ;;  %v700_v41 = vrot.slane %v1146_v61, %v1311_v28  ;;  %v704_v0 = vrot.slane %v1146_v61, %v1314_v30 }
  0x6e   : > { %v758_v1 = vsel %vm733_vm0, %v548_v57, %v692_v62  ;;  %v759_v2 = vsel %vm733_vm0, %v552_v58, %v696_v63  ;;  %v760_v3 = vsel %vm733_vm0, %v556_v59, %v700_v41  ;;  %v761_v4 = vsel %vm733_vm0, %v560_v60, %v704_v0 }
  0x6f   : > { %v892_v5 = vcombine.low %v758_v1, %v759_v2  ;;  %v893_v6 = vcombine.low %v760_v3, %v761_v4 }
  0x71   : > { %v900_v7 = vrot.slane %v892_v5, %v1326_v46  ;;  %v907_v26 = vrot.slane %v893_v6, %v1326_v46 }
  0x73   : > { %v908_v8 = vcombine.low %v900_v7, %v907_v26 }
  0x75   : > { %922 = vst [vmem:[%s1360_s27 + $0x30] sm:$0xff] %v908_v8 }
  0x76 PF: > { %s15_s18 = sadd.s32 1, %s1169_s18   ;;  %s1455_s16 = smov %s1165_s17 }
  0x77   : > { %p12_p5 = scmp.ge.s32.totalorder %s15_s18, 4   ;;  %s1456_s17 = smov %s1458_s0 }
  0x79   :  { %14 = sbr.rel (!%p12_p5) target bundleno = 3 (0x3), region = 97 }

</bundles_post_ra>
